<compile_context>
chip_gen: v6e
topology: v6e:2x2x1
jax: 0.10.0
libtpu: 0.0.40
codegen_flags: <defaults>
</compile_context>

<pallas_src>
import functools
import math

import jax
import jax.numpy as jnp
from jax.experimental import pallas as pl
from jax.experimental.pallas import tpu as pltpu

ROW_TILE_MAX = 4096          # max rows of x per grid step (multiple of 8)
MIN_GRID_STEPS = 4           # keep >= this many steps when the batch allows (v7x)
X_VMEM_BUDGET = 12 * 1024 * 1024   # bytes allowed for x's f32 double buffer


def _round_up(a, m):
    return ((a + m - 1) // m) * m


def mlp_kernel(x_ref, w1_ref, b1_ref, w2_ref, b2_ref, o_ref):
    # x_ref : (TM, IN)   f32   (bf16 cast done here, rides in VPU slack)
    # w1_ref: (IN, HPAD) bf16  b1_ref: (1, HPAD) f32
    # w2_ref: (HPAD, OPAD) bf16  b2_ref: (1, OUT) f32
    # o_ref : (TM, OUT)  f32   (narrow, un-padded store)
    x_bf = x_ref[...].astype(jnp.bfloat16)
    h = jnp.dot(x_bf, w1_ref[...], preferred_element_type=jnp.float32)
    h = jnp.maximum(h + b1_ref[...], 0.0)
    y = jnp.dot(h.astype(jnp.bfloat16), w2_ref[...],
                preferred_element_type=jnp.float32)          # (TM, OPAD)
    out_size = o_ref.shape[-1]
    o_ref[...] = (y[:, :out_size] + b2_ref[...]).astype(o_ref.dtype)


def prepare_params(w1, b1, w2, b2):
    """One-time glue: transpose PyTorch (out,in) weights, zero-pad hidden->128
    (numerically exact), cast matmul operands to bf16. Biases stay f32."""
    hidden, in_size = w1.shape
    out_size = w2.shape[0]
    h_pad = _round_up(hidden, 128)
    o_pad = _round_up(out_size, 128)   # MXU contraction stays 128-wide

    w1t = jnp.zeros((in_size, h_pad), jnp.float32).at[:, :hidden].set(w1.T)
    b1p = jnp.zeros((1, h_pad), jnp.float32).at[:, :hidden].set(b1)
    w2t = jnp.zeros((h_pad, o_pad), jnp.float32).at[:hidden, :out_size].set(w2.T)
    b2p = b2.reshape(1, out_size).astype(jnp.float32)

    return (w1t.astype(jnp.bfloat16), b1p,
            w2t.astype(jnp.bfloat16), b2p, out_size)


@functools.partial(jax.jit, static_argnames=("out_size",))
def neuralnet_forward(x, w1t, b1p, w2t, b2p, *, out_size):
    """Forward pass of NeuralNet: (N, in_size) f32 -> (N, out_size) f32."""
    n, in_size = x.shape
    h_pad = w1t.shape[1]
    o_pad = w2t.shape[1]

    # Row tile: big enough to amortize per-step overhead, capped by
    #  (a) VMEM budget for x's f32 double buffer, (b) >= MIN_GRID_STEPS steps
    #  for large batches so both v7x TensorCores stay busy.
    tm_steps = _round_up(pl.cdiv(n, MIN_GRID_STEPS), 8)
    tm_vmem = max(8, (X_VMEM_BUDGET // (2 * in_size * 4)) // 8 * 8)
    tm = max(8, min(ROW_TILE_MAX, tm_vmem, tm_steps))

    resident = lambda i: (0, 0)  # weights/biases: same block every grid step

    y = pl.pallas_call(
        mlp_kernel,
        out_shape=jax.ShapeDtypeStruct((n, out_size), jnp.float32),
        grid_spec=pltpu.PrefetchScalarGridSpec(
            num_scalar_prefetch=0,
            grid=(pl.cdiv(n, tm),),          # ragged last block handled by Pallas
            in_specs=[
                pl.BlockSpec((tm, in_size), lambda i: (i, 0)),
                pl.BlockSpec((in_size, h_pad), resident),
                pl.BlockSpec((1, h_pad), resident),
                pl.BlockSpec((h_pad, o_pad), resident),
                pl.BlockSpec((1, out_size), resident),
            ],
            out_specs=pl.BlockSpec((tm, out_size), lambda i: (i, 0)),
        ),
        compiler_params=pltpu.CompilerParams(
            dimension_semantics=("parallel",),
            vmem_limit_bytes=32 * 1024 * 1024,
        ),
    )(x, w1t, b1p, w2t, b2p)

    return y


def init_params(key, in_size, hidden, out_size):
    """Deterministic init mimicking PyTorch nn.Linear defaults
    (uniform in [-1/sqrt(fan_in), 1/sqrt(fan_in)])."""
    k1, k2, k3, k4 = jax.random.split(key, 4)
    bound1 = 1.0 / math.sqrt(in_size)
    bound2 = 1.0 / math.sqrt(hidden)
    w1 = jax.random.uniform(k1, (hidden, in_size), jnp.float32, -bound1, bound1)
    b1 = jax.random.uniform(k2, (hidden,), jnp.float32, -bound1, bound1)
    w2 = jax.random.uniform(k3, (out_size, hidden), jnp.float32, -bound2, bound2)
    b2 = jax.random.uniform(k4, (out_size,), jnp.float32, -bound2, bound2)
    return w1, b1, w2, b2


def _reference_checks(x, y, w1, b1, w2, b2):
    # Module-semantics reference in f32 (loose tol: kernel uses bf16 operands).
    h32 = jnp.maximum(x @ w1.T + b1, 0.0)
    y32 = h32 @ w2.T + b2
    assert jnp.allclose(y, y32, atol=5e-2, rtol=5e-2)

    # Precision-matched reference (same bf16-rounded operands, f32 accumulate).
    xb = x.astype(jnp.bfloat16).astype(jnp.float32)
    w1b = w1.T.astype(jnp.bfloat16).astype(jnp.float32)
    w2b = w2.T.astype(jnp.bfloat16).astype(jnp.float32)
    hb = jnp.maximum(xb @ w1b + b1, 0.0)
    yb = hb.astype(jnp.bfloat16).astype(jnp.float32) @ w2b + b2
    assert jnp.allclose(y, yb, atol=5e-3, rtol=5e-3)


if __name__ == "__main__":
    # Small shapes consistent with forward(x: (N, in_size)) -> (N, out_size).
    N, IN_SIZE, HIDDEN, OUT_SIZE = 8, 32, 100, 4

    key = jax.random.PRNGKey(0)
    kx, kp, kx2 = jax.random.split(key, 3)
    x = jax.random.normal(kx, (N, IN_SIZE), jnp.float32)
    w1, b1, w2, b2 = init_params(kp, IN_SIZE, HIDDEN, OUT_SIZE)

    # One-time parameter preparation (transpose + pad + bf16 cast), then forward.
    w1t, b1p, w2t, b2p, out_size = prepare_params(w1, b1, w2, b2)
    y = neuralnet_forward(x, w1t, b1p, w2t, b2p, out_size=out_size)
    jax.block_until_ready(y)
    assert y.shape == (N, OUT_SIZE)
    _reference_checks(x, y, w1, b1, w2, b2)

    # Ragged batch (not a multiple of the row tile): exercises Pallas's
    # partial-last-block masking now that the explicit jnp.pad is gone.
    N2 = 13
    x2 = jax.random.normal(kx2, (N2, IN_SIZE), jnp.float32)
    y2 = neuralnet_forward(x2, w1t, b1p, w2t, b2p, out_size=out_size)
    jax.block_until_ready(y2)
    assert y2.shape == (N2, OUT_SIZE)
    _reference_checks(x2, y2, w1, b1, w2, b2)

    # TODO(synk): training (loss_fn / SGD step) from the PyTorch module is not
    # implemented here; only the forward pass maps to a Pallas kernel.
    print("KERNEL_OK")
</pallas_src>

<mosaic_0001>
module attributes {stable_mosaic.version = 11 : i64} {
  func.func @mlp_kernel(%arg0: i32, %arg1: memref<8x32xf32, #tpu.memory_space<vmem>>, %arg2: memref<32x128xbf16, #tpu.memory_space<vmem>>, %arg3: memref<1x128xf32, #tpu.memory_space<vmem>>, %arg4: memref<128x128xbf16, #tpu.memory_space<vmem>>, %arg5: memref<1x4xf32, #tpu.memory_space<vmem>>, %arg6: memref<8x4xf32, #tpu.memory_space<vmem>>) attributes {dimension_semantics = [#tpu.dimension_semantics<parallel>], iteration_bounds = array<i64: 1>, scalar_prefetch = 0 : i64, scratch_operands = 0 : i64, tpu.core_type = #tpu.core_type<tc>, window_params = [{transform_indices = @transform_0, window_bounds = array<i64: 8, 32>}, {pipeline_mode = #tpu.pipeline_mode<synchronous>, transform_indices = @transform_1, window_bounds = array<i64: 32, 128>}, {pipeline_mode = #tpu.pipeline_mode<synchronous>, transform_indices = @transform_2, window_bounds = array<i64: 1, 128>}, {pipeline_mode = #tpu.pipeline_mode<synchronous>, transform_indices = @transform_3, window_bounds = array<i64: 128, 128>}, {pipeline_mode = #tpu.pipeline_mode<synchronous>, transform_indices = @transform_4, window_bounds = array<i64: 1, 4>}, {transform_indices = @transform_5, window_bounds = array<i64: 8, 4>}]} {
    %c0 = arith.constant 0 : index
    %c0_0 = arith.constant 0 : index
    %0 = vector.load %arg1[%c0, %c0_0] : memref<8x32xf32, #tpu.memory_space<vmem>>, vector<8x32xf32>
    %1 = arith.truncf %0 : vector<8x32xf32> to vector<8x32xbf16>
    %c0_1 = arith.constant 0 : index
    %c0_2 = arith.constant 0 : index
    %2 = vector.load %arg2[%c0_1, %c0_2] : memref<32x128xbf16, #tpu.memory_space<vmem>>, vector<32x128xbf16>
    %cst = arith.constant dense<0.000000e+00> : vector<8x128xf32>
    %3 = tpu.matmul %1, %2, %cst {dimension_numbers = #tpu.dot_dimension_numbers<[1], [0], [0], [1], [0, 0, 1, 1], [], []>} : vector<8x32xbf16>, vector<32x128xbf16>, vector<8x128xf32> -> vector<8x128xf32>
    %c0_3 = arith.constant 0 : index
    %c0_4 = arith.constant 0 : index
    %4 = vector.load %arg3[%c0_3, %c0_4] : memref<1x128xf32, #tpu.memory_space<vmem>>, vector<1x128xf32>
    %5 = vector.broadcast %4 : vector<1x128xf32> to vector<8x128xf32>
    %6 = arith.addf %3, %5 : vector<8x128xf32>
    %cst_5 = arith.constant 0.000000e+00 : f32
    %7 = vector.broadcast %cst_5 : f32 to vector<8x128xf32>
    %8 = arith.maximumf %6, %7 : vector<8x128xf32>
    %9 = arith.truncf %8 : vector<8x128xf32> to vector<8x128xbf16>
    %c0_6 = arith.constant 0 : index
    %c0_7 = arith.constant 0 : index
    %10 = vector.load %arg4[%c0_6, %c0_7] : memref<128x128xbf16, #tpu.memory_space<vmem>>, vector<128x128xbf16>
    %cst_8 = arith.constant dense<0.000000e+00> : vector<8x128xf32>
    %11 = tpu.matmul %9, %10, %cst_8 {dimension_numbers = #tpu.dot_dimension_numbers<[1], [0], [0], [1], [0, 0, 1, 1], [], []>} : vector<8x128xbf16>, vector<128x128xbf16>, vector<8x128xf32> -> vector<8x128xf32>
    %12 = vector.extract_strided_slice %11 {offsets = [0, 0], sizes = [8, 4], strides = [1, 1]} : vector<8x128xf32> to vector<8x4xf32>
    %c0_9 = arith.constant 0 : index
    %c0_10 = arith.constant 0 : index
    %13 = vector.load %arg5[%c0_9, %c0_10] : memref<1x4xf32, #tpu.memory_space<vmem>>, vector<1x4xf32>
    %14 = vector.broadcast %13 : vector<1x4xf32> to vector<8x4xf32>
    %15 = arith.addf %12, %14 : vector<8x4xf32>
    %c0_11 = arith.constant 0 : index
    %c0_12 = arith.constant 0 : index
    %16 = vector.load %arg6[%c0_11, %c0_12] : memref<8x4xf32, #tpu.memory_space<vmem>>, vector<8x4xf32>
    tpu.vector_store %arg6[%c0_11, %c0_12], %15 {strides = array<i32>} : memref<8x4xf32, #tpu.memory_space<vmem>>, vector<8x4xf32>,
    return
  }
  func.func @transform_0(%arg0: i32) -> (i32, i32) {
    %c0_i32 = arith.constant 0 : i32
    %c0_i32_0 = arith.constant 0 : i32
    return %arg0, %c0_i32 : i32, i32
  }
  func.func @transform_1(%arg0: i32) -> (i32, i32) {
    %c0_i32 = arith.constant 0 : i32
    %c0_i32_0 = arith.constant 0 : i32
    %c0_i32_1 = arith.constant 0 : i32
    return %c0_i32, %c0_i32_0 : i32, i32
  }
  func.func @transform_2(%arg0: i32) -> (i32, i32) {
    %c0_i32 = arith.constant 0 : i32
    %c0_i32_0 = arith.constant 0 : i32
    %c0_i32_1 = arith.constant 0 : i32
    return %c0_i32, %c0_i32_0 : i32, i32
  }
  func.func @transform_3(%arg0: i32) -> (i32, i32) {
    %c0_i32 = arith.constant 0 : i32
    %c0_i32_0 = arith.constant 0 : i32
    %c0_i32_1 = arith.constant 0 : i32
    return %c0_i32, %c0_i32_0 : i32, i32
  }
  func.func @transform_4(%arg0: i32) -> (i32, i32) {
    %c0_i32 = arith.constant 0 : i32
    %c0_i32_0 = arith.constant 0 : i32
    %c0_i32_1 = arith.constant 0 : i32
    return %c0_i32, %c0_i32_0 : i32, i32
  }
  func.func @transform_5(%arg0: i32) -> (i32, i32) {
    %c0_i32 = arith.constant 0 : i32
    %c0_i32_0 = arith.constant 0 : i32
    return %arg0, %c0_i32 : i32, i32
  }
}

</mosaic_0001>

<bundles_post_ra>
// kernel: neuralnet_forward.1
= control target key start
LH: loop header
LB: loop body
LE: loop exit
PB: predicated region body
PF: predicated region fallthrough
CT: control target
= control target key end

     0   :  { %10 = vsyncpa [#allocation3], 0  ;;  %s440_s0 = inlined_call_operand.hbm [shape: f32[8,32], index: 0, kind: input, shape index: {}]   ;;  %s441_s1 = inlined_call_operand.hbm [shape: bf16[32,128], index: 1, kind: input, shape index: {}]   ;;  %s442_s2 = inlined_call_operand.vmem [shape: f32[1,128], index: 2, kind: input, shape index: {}]   ;;  %s443_s3 = inlined_call_operand.hbm [shape: bf16[128,128], index: 3, kind: input, shape index: {}]   ;;  %s444_s4 = inlined_call_operand.vmem [shape: f32[1,4], index: 4, kind: input, shape index: {}]   ;;  %s445_s5 = inlined_call_operand.vmem [shape: f32[8,4], index: 5, kind: output, shape index: {}]  }
   0x1   :  { %11 = vsyncpa [#allocation5], 0  ;;  %s385_s18 = smov [#allocation4]  }
   0x2   :  { %s27_s19 = sshll.u32 %s385_s18, 4  ;;  %s28_s19 = int_to_ptr.vmem [resolvable:$true] %s27_s19 }
   0x3   :  { %s329_s20 = scalar_lea.vmem %s28_s19, 256  ;;  %p334_p1 = scmp.lt.s32.totalorder %s28_s19, %s28_s19 }
   0x4   :  { %p330_p0 = scmp.ne.s32.totalorder %s28_s19, %s329_s20  ;;  %p335_p2 = scmp.lt.s32.totalorder %s329_s20, %s329_s20 }
   0x6   :  { %p336_p3 = por %p335_p2, %p334_p1 }
   0x8   :  { %p337_p4 = pnand %p336_p3, %p330_p0 }
   0xa   :  { %340 = shalt.err (!%p337_p4)
}
   0xb   :  { %s386_s21 = smov 64   ;;  %s387_s22 = smov 4  }
   0xc   :  { %33 = dma.hbm_to_vmem [thread:$0]  %s441_s1, 256, %s28_s19, [#allocation5], %s386_s21, %s386_s21, %s387_s22  }
   0xd   :  { %s388_s25 = smov [#allocation2]   ;;  %s389_s27 = smov [#allocation6]  }
   0xe   :  { %s18_s26 = sshll.u32 %s388_s25, 4  ;;  %s41_s28 = sshll.u32 %s389_s27, 4  ;;  %s19_s26 = int_to_ptr.vmem [resolvable:$true] %s18_s26  ;;  %s42_s28 = int_to_ptr.vmem [resolvable:$true] %s41_s28 }
   0xf   :  { %s349_s29 = scalar_lea.vmem %s19_s26, 128  ;;  %p354_p6 = scmp.lt.s32.totalorder %s19_s26, %s19_s26 }
  0x10   :  { %p350_p5 = scmp.ne.s32.totalorder %s19_s26, %s349_s29  ;;  %p355_p7 = scmp.lt.s32.totalorder %s349_s29, %s349_s29 }
  0x12   :  { %p356_p8 = por %p355_p7, %p354_p6 }
  0x14   :  { %p357_p9 = pnand %p356_p8, %p350_p5 }
  0x16   :  { %360 = shalt.err (!%p357_p9)
}
  0x17   :  { %21 = dma.hbm_to_vmem [thread:$0]  %s440_s0, 128, %s19_s26, [#allocation3]  }
  0x18   :  { %s369_s7 = scalar_lea.vmem %s42_s28, 1024  ;;  %p374_p11 = scmp.lt.s32.totalorder %s42_s28, %s42_s28 }
  0x19   :  { %p370_p10 = scmp.ne.s32.totalorder %s42_s28, %s369_s7  ;;  %p375_p12 = scmp.lt.s32.totalorder %s369_s7, %s369_s7 }
  0x1b   :  { %p376_p13 = por %p375_p12, %p374_p11 }
  0x1d   :  { %p377_p0 = pnand %p376_p13, %p370_p10 }
  0x1f   :  { %380 = shalt.err (!%p377_p0)
}
  0x20   :  { %47 = dma.hbm_to_vmem [thread:$0]  %s443_s3, 1024, %s42_s28, [#allocation5], %s386_s21, %s386_s21, %s387_s22  }
  0x21   :  { %381 = dma.done.wait [#allocation3], 128  }
  0x22   :  { %382 = vsyncadd [#allocation3], 4294967168 }
  0x23   :  { %383 = dma.done.wait [#allocation5], 1280  }
  0x24   :  { %384 = vsyncadd [#allocation5], 4294966016  ;;  %v390_v0 = vmov 0.0   ;;  %vm391_vm0 = vmmov 0   ;;  %v311_v1 = vld [vmem:[#allocation4 + $0x8] sm:$0xff]   ;;  %v312_v2 = vld [vmem:[#allocation4] sm:$0xff]  }
  0x25   :  { %276 = vmatprep.subr.bf16.mxu0 %v390_v0  ;;  %280 = vmatprep.mubr.msk.bf16.mxu0 %vm391_vm0, %v390_v0  ;;  %v60_v3 = vld [vmem:[#allocation2] sm:$0xff]  ;;  %v313_v4 = vld [vmem:[#allocation6 + $0x38] sm:$0xff]   ;;  %v314_v6 = vld [vmem:[#allocation6 + $0x30] sm:$0xff]   ;;  %vm85_vm1 = vcmask 261120   ;;  %vm243_vm2 = vcmask 31744  }
  0x26   :  { %284 = vmatprep.subr.bf16.mxu1 %v390_v0  ;;  %300 = vmatprep.mubr.msk.bf16.mxu1 %vm391_vm0, %v390_v0  ;;  %v61_v5 = vpack.c.bf16 %v60_v3, %v60_v3  ;;  %v315_v7 = vld [vmem:[#allocation6 + $0x28] sm:$0xff]   ;;  %v316_v8 = vld [vmem:[#allocation6 + $0x20] sm:$0xff]   ;;  %v317_v9 = vld [vmem:[#allocation6 + $0x18] sm:$0xff]  }
  0x27   :  { %277 = vmatpush3.bf16.msra.mxu0 %v311_v1  ;;  %285 = vmatpush3.bf16.msra.mxu1 %v313_v4  ;;  %v318_v10 = vld [vmem:[#allocation6 + $0x10] sm:$0xff]   ;;  %v319_v11 = vld [vmem:[#allocation6 + $0x8] sm:$0xff]   ;;  %v320_v12 = vld [vmem:[#allocation6] sm:$0xff]  }
  0x28   :  { %278 = vmatprep.subr.bf16.mxu0 %v390_v0  ;;  %286 = vmatprep.subr.bf16.mxu1 %v390_v0  ;;  %v251_v13 = vld [vmem:[%s442_s2] ss:$0 sm:$0xff] }
  0x29   :  { %v263_v21 = vld [vmem:[%s444_s4] ss:$0 sm:$0xff] }
  0x2b   :  { %279 = vmatpush3.bf16.msra.mxu0 %v312_v2  ;;  %287 = vmatpush3.bf16.msra.mxu1 %v314_v6 }
  0x2c   :  { %288 = vmatprep.subr.bf16.mxu1 %v390_v0 }
  0x2e   :  { %281 = vmatmul.mubr.msk.bf16.vlgmr.msra.gmra.mxu0 %vm85_vm1, %v61_v5 }
  0x2f   :  { %289 = vmatpush3.bf16.msra.mxu1 %v315_v7 }
  0x30   :  { %290 = vmatprep.subr.bf16.mxu1 %v390_v0 }
  0x33   :  { %291 = vmatpush3.bf16.msra.mxu1 %v316_v8 }
  0x34   :  { %292 = vmatprep.subr.bf16.mxu1 %v390_v0 }
  0x37   :  { %293 = vmatpush3.bf16.msra.mxu1 %v317_v9 }
  0x38   :  { %294 = vmatprep.subr.bf16.mxu1 %v390_v0 }
  0x3b   :  { %295 = vmatpush3.bf16.msra.mxu1 %v318_v10 }
  0x3c   :  { %296 = vmatprep.subr.bf16.mxu1 %v390_v0 }
  0x3f   :  { %297 = vmatpush3.bf16.msra.mxu1 %v319_v11 }
  0x40   :  { %298 = vmatprep.subr.bf16.mxu1 %v390_v0 }
  0x43   :  { %299 = vmatpush3.bf16.msra.mxu1 %v320_v12 }
  0xee   :  { %v123_v14 = vpop.f32.mrf.mxu0 }
  0xef   :  { %v124_v15 = vadd.f32 %v251_v13, %v123_v14 }
  0xf0   :  { %v282_v16 = vpop.f32.mrf.mxu0 }
  0xf1   :  { %v129_v17 = vmax.f32 %v124_v15, 0.0 }
  0xf2   :  { %v126_v18 = vpop.f32.mrf.mxu0 }
  0xf3   :  { %v130_v19 = vpack.c.bf16 %v129_v17, %v129_v17 }
  0xf4   :  { %v283_v20 = vpop.f32.mrf.mxu0 }
  0xf5   :  { %301 = vmatmul.mubr.bf16.vlgmr.msra.gmra.mxu1 %v130_v19 }
 0x1b5   :  { %v229_v22 = vpop.f32.mrf.mxu1 }
 0x1b6   :  { %v242_v23 = vadd.f32 %v263_v21, %v229_v22 }
 0x1b7   :  { %v302_v24 = vpop.f32.mrf.mxu1 }
 0x1b8   :  { %244 = vst.msk [vmem:[%s445_s5] sm:$0xff] %vm243_vm2, %v242_v23 }
 0x1b9   :  { %v232_v25 = vpop.f32.mrf.mxu1 }
 0x1bb   :  { %v303_v26 = vpop.f32.mrf.mxu1 }
 0x1bc   :  { %249 = vsyncpa [#allocation3], 1 }
 0x1bd   :  { %250 = vsyncpa [#allocation5], 1 }

</bundles_post_ra>
